<compile_context>
chip_gen: v7x
topology: tpu7x:2x2x1
jax: 0.10.0
libtpu: 0.0.40
codegen_flags: <defaults>
</compile_context>

<pallas_src>
import jax
import jax.numpy as jnp
from jax.experimental import pallas as pl
from jax.experimental.pallas import tpu as pltpu


def _round_up(x, m):
    return (x + m - 1) // m * m


def _feat_pad(d):
    # One 128-lane vreg when the real dim fits; otherwise a multiple of 256
    # (v6e/v7x MXUs are 256 wide; 128 is already native on v5e).
    return 128 if d <= 128 else _round_up(d, 256)


def _fused_gcn_kernel(relu_ref,       # [L] int32, SMEM (scalar prefetch)
                      x_hbm_ref,      # [Np, Fin_p] f32, HBM (pl.ANY)
                      adj_ref,        # [Np, Np]   bf16, resident VMEM (1 buf)
                      dinv_ref,       # [Np, 1]    f32
                      w_ref,          # [1, Fin_p, Fout_p] this layer's weight
                      b_ref,          # [1, 1, Fout_p]     this layer's bias
                      o_ref,          # [1, Np, Fout_p]    this layer's output
                      act_ref,        # VMEM scratch [Np, Fin_p] f32
                      sem_ref):       # DMA semaphore (x seed copy)
    layer = pl.program_id(0)

    # Layer 0: seed the running activation straight from HBM; x never becomes
    # a resident pipeline buffer.
    @pl.when(layer == 0)
    def _seed():
        cp = pltpu.make_async_copy(x_hbm_ref, act_ref, sem_ref)
        cp.start()
        cp.wait()

    dinv = dinv_ref[...]                                   # [Np, 1]
    w = w_ref[0]                                           # [Fin_p, Fout_p]
    b = b_ref[0]                                           # [1, Fout_p]

    # X @ W on the MXU (f32).
    xw = jnp.dot(act_ref[...], w, preferred_element_type=jnp.float32)

    # D^-1/2 A D^-1/2 (XW) == dinv * (A @ (dinv * XW)).  The big A-matmul runs
    # with bf16 operands (adj is exact 0/1 in bf16), f32 accumulation.
    rhs = (dinv * xw).astype(adj_ref.dtype)
    out = dinv * jnp.dot(adj_ref[...], rhs,
                         preferred_element_type=jnp.float32) + b

    # Branchless per-layer ReLU: max with 0 when enabled, with -inf otherwise.
    floor = jnp.where(relu_ref[layer] != 0, 0.0, -jnp.inf)
    out = jnp.maximum(out, floor)

    # Single store to the per-layer embedding and single store to the running
    # activation from the same register values (no reload in between).
    o_ref[0] = out.astype(o_ref.dtype)
    k = min(act_ref.shape[1], out.shape[1])   # static, multiple of 128
    act_ref[:, :k] = out[:, :k]


def dense_gcn_block(x, adj, weights, biases, relu_layers_index=(),
                    dropout_layers_index=(), dropout_rate=0.0):
    """DenseGCNBlock.forward (add_loop=False). Returns per-layer embeddings."""
    # TODO(synk): dropout is identity for rate=0.0 (module default) / eval
    # mode; stochastic dropout (training) is not implemented.
    del dropout_layers_index, dropout_rate

    n, f_in = x.shape
    num_layers = len(weights)
    assert num_layers >= 1
    dims = [f_in] + [w.shape[1] for w in weights]

    # Padding: nodes to a multiple of 128; features rectangularly per role
    # (max input dim / max output dim over layers).  Zero padding is exact:
    # padded adjacency rows/cols are zero, padded weight rows/cols are zero.
    np_ = _round_up(n, 128)
    fin_p = _feat_pad(max(dims[:-1]))
    fout_p = _feat_pad(max(dims[1:]))

    x_p = jnp.zeros((np_, fin_p), jnp.float32).at[:n, :f_in].set(
        x.astype(jnp.float32))
    adj_f32 = jnp.zeros((np_, np_), jnp.float32).at[:n, :n].set(
        adj.astype(jnp.float32))

    # Degree normalization hoisted out of the kernel entirely.
    deg = jnp.sum(adj_f32, axis=-1, keepdims=True)
    dinv_p = jax.lax.rsqrt(jnp.maximum(deg, 1.0))           # [Np, 1] f32

    # 0/1 adjacency is exact in bf16: halves the dominant VMEM buffer and runs
    # the A-matmul at bf16 MXU peak.
    adj_p = adj_f32.astype(jnp.bfloat16)

    w_p = jnp.zeros((num_layers, fin_p, fout_p), jnp.float32)
    b_p = jnp.zeros((num_layers, 1, fout_p), jnp.float32)
    for i, (w, b) in enumerate(zip(weights, biases)):
        w_p = w_p.at[i, :w.shape[0], :w.shape[1]].set(w.astype(jnp.float32))
        b_p = b_p.at[i, 0, :b.shape[-1]].set(b.reshape(-1).astype(jnp.float32))

    relu_flags = jnp.array(
        [1 if i in relu_layers_index else 0 for i in range(num_layers)],
        dtype=jnp.int32)

    # VMEM budget for the buffers the pipeline actually allocates.
    vmem_needed = (np_ * np_ * 2                 # adj (bf16, single-buffered)
                   + 2 * np_ * 128 * 4           # dinv (x2 buffers, lane pad)
                   + 2 * fin_p * fout_p * 4      # weights (x2 buffers)
                   + 2 * 8 * fout_p * 4          # bias (x2 buffers)
                   + 2 * np_ * fout_p * 4        # per-layer output (x2)
                   + np_ * fin_p * 4)            # activation scratch
    try:
        vmem_cap = int(pltpu.get_tpu_info().vmem_capacity_bytes)
    except Exception:
        vmem_cap = 64 * 1024 * 1024              # v7x per-core floor
    vmem_limit = int(min(vmem_cap - (2 << 20),
                         max(vmem_needed * 5 // 4, 32 << 20)))

    flops = num_layers * (2 * np_ * fin_p * fout_p + 2 * np_ * np_ * fout_p)
    bytes_accessed = (np_ * np_ * 2 + np_ * fin_p * 4 + np_ * 4
                      + num_layers * (fin_p * fout_p + fout_p) * 4
                      + num_layers * np_ * fout_p * 4)

    out = pl.pallas_call(
        _fused_gcn_kernel,
        out_shape=jax.ShapeDtypeStruct((num_layers, np_, fout_p), jnp.float32),
        grid_spec=pltpu.PrefetchScalarGridSpec(
            num_scalar_prefetch=1,
            grid=(num_layers,),
            in_specs=[
                # x stays in HBM; DMA'd into the activation scratch once.
                pl.BlockSpec(memory_space=pl.ANY),
                # Constant block index -> fetched once; single-buffered so the
                # dominant adjacency is charged only once in VMEM.
                pl.BlockSpec((np_, np_), lambda l, flags: (0, 0),
                             pipeline_mode=pl.Buffered(1)),
                pl.BlockSpec((np_, 1), lambda l, flags: (0, 0)),        # dinv
                # One layer's parameters per grid step (double-buffered).
                pl.BlockSpec((1, fin_p, fout_p), lambda l, flags: (l, 0, 0)),
                pl.BlockSpec((1, 1, fout_p), lambda l, flags: (l, 0, 0)),
            ],
            out_specs=pl.BlockSpec((1, np_, fout_p),
                                   lambda l, flags: (l, 0, 0)),
            scratch_shapes=[
                pltpu.VMEM((np_, fin_p), jnp.float32),   # running activation
                pltpu.SemaphoreType.DMA(()),             # x seed DMA
            ],
        ),
        compiler_params=pltpu.CompilerParams(
            dimension_semantics=("arbitrary",),          # layers are sequential
            vmem_limit_bytes=vmem_limit,
        ),
        cost_estimate=pl.CostEstimate(flops=flops, transcendentals=0,
                                      bytes_accessed=bytes_accessed),
    )(relu_flags, x_p, adj_p, dinv_p, w_p, b_p)

    # Strip padding; torch.squeeze(output, 0) is implicit (batch dim is 1).
    return [out[i, :n, :dims[i + 1]] for i in range(num_layers)]


def _reference(x, adj, weights, biases, relu_layers_index, mixed=False):
    """Pure-JAX reference.  mixed=True mirrors the kernel's bf16 A-matmul rhs."""
    hi = jax.lax.Precision.HIGHEST
    deg = jnp.maximum(adj.sum(-1), 1.0)
    dinv = jax.lax.rsqrt(deg)[:, None]
    out = x
    embs = []
    for i, (w, b) in enumerate(zip(weights, biases)):
        xw = jnp.dot(out, w, precision=hi)
        rhs = dinv * xw
        if mixed:
            rhs = rhs.astype(jnp.bfloat16).astype(jnp.float32)
        out = dinv * jnp.dot(adj, rhs, precision=hi) + b.reshape(1, -1)
        if i in relu_layers_index:
            out = jnp.maximum(out, 0.0)
        embs.append(out)
    return embs


if __name__ == "__main__":
    key = jax.random.PRNGKey(0)
    n_nodes = 16
    gcn_layers_dim = [32, 64, 32]          # like DenseGCNBlock(gcn_layers_dim=...)
    relu_layers_index = [0, 1]

    k_x, k_a, k_w = jax.random.split(key, 3)
    x = jax.random.normal(k_x, (n_nodes, gcn_layers_dim[0]), dtype=jnp.float32)
    adj = (jax.random.uniform(k_a, (n_nodes, n_nodes)) > 0.5).astype(jnp.float32)
    adj = jnp.maximum(adj, adj.T)          # symmetric adjacency, no self loops

    weights, biases = [], []
    wkeys = jax.random.split(k_w, len(gcn_layers_dim) - 1)
    for i in range(len(gcn_layers_dim) - 1):
        fan_in, fan_out = gcn_layers_dim[i], gcn_layers_dim[i + 1]
        scale = jnp.sqrt(6.0 / (fan_in + fan_out))   # glorot, like DenseGCNConv
        weights.append(jax.random.uniform(
            wkeys[i], (fan_in, fan_out), minval=-scale, maxval=scale,
            dtype=jnp.float32))
        biases.append(jnp.zeros((1, fan_out), dtype=jnp.float32))

    embeddings = dense_gcn_block(x, adj, weights, biases,
                                 relu_layers_index=relu_layers_index)
    embeddings = [jax.block_until_ready(e) for e in embeddings]

    refs_exact = _reference(x, adj, weights, biases, relu_layers_index)
    refs_mixed = _reference(x, adj, weights, biases, relu_layers_index,
                            mixed=True)
    for e, rm, rx in zip(embeddings, refs_mixed, refs_exact):
        assert e.shape == rx.shape
        # Tight check vs a reference mirroring the kernel's bf16 A-matmul rhs.
        assert jnp.allclose(e, rm, atol=5e-3, rtol=5e-3), "mismatch (mirrored)"
        # Loose check vs exact-f32 module semantics (bounds the bf16 rounding).
        assert jnp.allclose(e, rx, atol=3e-2, rtol=3e-2), "mismatch (exact)"

    print("KERNEL_OK")
</pallas_src>

<mosaic_0001>
module attributes {stable_mosaic.version = 11 : i64} {
  func.func @_fused_gcn_kernel(%arg0: i32, %arg1: memref<2xi32, #tpu.memory_space<smem>>, %arg2: memref<128x128xf32, #tpu.memory_space<any>>, %arg3: memref<128x128xbf16, #tpu.memory_space<vmem>>, %arg4: memref<128x1xf32, #tpu.memory_space<vmem>>, %arg5: memref<1x128x128xf32, #tpu.memory_space<vmem>>, %arg6: memref<1x1x128xf32, #tpu.memory_space<vmem>>, %arg7: memref<1x128x128xf32, #tpu.memory_space<vmem>>, %arg8: memref<128x128xf32, #tpu.memory_space<vmem>>, %arg9: memref<!tpu.dma_semaphore, #tpu.memory_space<semaphore_mem>>) attributes {dimension_semantics = [#tpu.dimension_semantics<arbitrary>], iteration_bounds = array<i64: 2>, scalar_prefetch = 1 : i64, scratch_operands = 2 : i64, tpu.core_type = #tpu.core_type<tc>, window_params = [{}, {pipeline_mode = #tpu.pipeline_mode<synchronous>, transform_indices = @transform_1, window_bounds = array<i64: 128, 128>}, {pipeline_mode = #tpu.pipeline_mode<synchronous>, transform_indices = @transform_2, window_bounds = array<i64: 128, 1>}, {transform_indices = @transform_3, window_bounds = array<i64: 1, 128, 128>}, {transform_indices = @transform_4, window_bounds = array<i64: 1, 1, 128>}, {transform_indices = @transform_5, window_bounds = array<i64: 1, 128, 128>}]} {
    %c0_i32 = arith.constant 0 : i32
    %0 = arith.cmpi eq, %arg0, %c0_i32 : i32
    %1 = arith.extui %0 : i1 to i32
    %c0_i32_0 = arith.constant 0 : i32
    %2 = arith.cmpi ne, %1, %c0_i32_0 : i32
    scf.if %2 {
      tpu.enqueue_dma source(%arg2 : memref<128x128xf32, #tpu.memory_space<any>>) target(%arg8 : memref<128x128xf32, #tpu.memory_space<vmem>>) target_semaphore(%arg9 : memref<!tpu.dma_semaphore, #tpu.memory_space<semaphore_mem>>)
      tpu.wait_dma2 semaphore(%arg9 : memref<!tpu.dma_semaphore, #tpu.memory_space<semaphore_mem>>) src(%arg2 : memref<128x128xf32, #tpu.memory_space<any>>) dst(%arg8 : memref<128x128xf32, #tpu.memory_space<vmem>>)
    } else {
    }
    %c0 = arith.constant 0 : index
    %c0_1 = arith.constant 0 : index
    %3 = vector.load %arg4[%c0, %c0_1] : memref<128x1xf32, #tpu.memory_space<vmem>>, vector<128x1xf32>
    %c0_2 = arith.constant 0 : index
    %c0_3 = arith.constant 0 : index
    %c0_4 = arith.constant 0 : index
    %4 = vector.load %arg5[%c0_2, %c0_3, %c0_4] : memref<1x128x128xf32, #tpu.memory_space<vmem>>, vector<1x128x128xf32>
    %5 = vector.shape_cast %4 : vector<1x128x128xf32> to vector<128x128xf32>
    %c0_5 = arith.constant 0 : index
    %c0_6 = arith.constant 0 : index
    %c0_7 = arith.constant 0 : index
    %6 = vector.load %arg6[%c0_5, %c0_6, %c0_7] : memref<1x1x128xf32, #tpu.memory_space<vmem>>, vector<1x1x128xf32>
    %7 = vector.shape_cast %6 : vector<1x1x128xf32> to vector<1x128xf32>
    %c0_8 = arith.constant 0 : index
    %c0_9 = arith.constant 0 : index
    %8 = vector.load %arg8[%c0_8, %c0_9] : memref<128x128xf32, #tpu.memory_space<vmem>>, vector<128x128xf32>
    %cst = arith.constant dense<0.000000e+00> : vector<128x128xf32>
    %9 = tpu.matmul %8, %5, %cst {dimension_numbers = #tpu.dot_dimension_numbers<[1], [0], [0], [1], [0, 0, 1, 1], [], []>} : vector<128x128xf32>, vector<128x128xf32>, vector<128x128xf32> -> vector<128x128xf32>
    %10 = vector.broadcast %3 : vector<128x1xf32> to vector<128x128xf32>
    %11 = arith.mulf %10, %9 : vector<128x128xf32>
    %12 = arith.truncf %11 : vector<128x128xf32> to vector<128x128xbf16>
    %c0_10 = arith.constant 0 : index
    %c0_11 = arith.constant 0 : index
    %13 = vector.load %arg3[%c0_10, %c0_11] : memref<128x128xbf16, #tpu.memory_space<vmem>>, vector<128x128xbf16>
    %cst_12 = arith.constant dense<0.000000e+00> : vector<128x128xf32>
    %14 = tpu.matmul %13, %12, %cst_12 {dimension_numbers = #tpu.dot_dimension_numbers<[1], [0], [0], [1], [0, 0, 1, 1], [], []>} : vector<128x128xbf16>, vector<128x128xbf16>, vector<128x128xf32> -> vector<128x128xf32>
    %15 = vector.broadcast %3 : vector<128x1xf32> to vector<128x128xf32>
    %16 = arith.mulf %15, %14 : vector<128x128xf32>
    %17 = vector.broadcast %7 : vector<1x128xf32> to vector<128x128xf32>
    %18 = arith.addf %16, %17 : vector<128x128xf32>
    %19 = arith.index_cast %arg0 : i32 to index
    %20 = memref.load %arg1[%19] : memref<2xi32, #tpu.memory_space<smem>>
    %c0_i32_13 = arith.constant 0 : i32
    %21 = arith.cmpi ne, %20, %c0_i32_13 : i32
    %cst_14 = arith.constant 0.000000e+00 : f32
    %cst_15 = arith.constant 0xFF800000 : f32
    %22 = arith.select %21, %cst_14, %cst_15 : f32
    %23 = vector.broadcast %22 : f32 to vector<128x128xf32>
    %24 = arith.maximumf %18, %23 : vector<128x128xf32>
    %c0_16 = arith.constant 0 : index
    %c0_17 = arith.constant 0 : index
    %c0_18 = arith.constant 0 : index
    %25 = vector.load %arg7[%c0_16, %c0_17, %c0_18] : memref<1x128x128xf32, #tpu.memory_space<vmem>>, vector<1x128x128xf32>
    %26 = vector.shape_cast %25 : vector<1x128x128xf32> to vector<128x128xf32>
    %27 = vector.shape_cast %24 : vector<128x128xf32> to vector<1x128x128xf32>
    tpu.vector_store %arg7[%c0_16, %c0_17, %c0_18], %27 {strides = array<i32>} : memref<1x128x128xf32, #tpu.memory_space<vmem>>, vector<1x128x128xf32>,
    %c0_19 = arith.constant 0 : index
    %c0_20 = arith.constant 0 : index
    %28 = vector.load %arg8[%c0_19, %c0_20] : memref<128x128xf32, #tpu.memory_space<vmem>>, vector<128x128xf32>
    tpu.vector_store %arg8[%c0_19, %c0_20], %24 {strides = array<i32>} : memref<128x128xf32, #tpu.memory_space<vmem>>, vector<128x128xf32>,
    return
  }
  func.func @transform_1(%arg0: i32, %arg1: memref<2xi32, #tpu.memory_space<smem>>) -> (i32, i32) {
    %c0_i32 = arith.constant 0 : i32
    %c0_i32_0 = arith.constant 0 : i32
    %c0_i32_1 = arith.constant 0 : i32
    return %c0_i32, %c0_i32_0 : i32, i32
  }
  func.func @transform_2(%arg0: i32, %arg1: memref<2xi32, #tpu.memory_space<smem>>) -> (i32, i32) {
    %c0_i32 = arith.constant 0 : i32
    %c0_i32_0 = arith.constant 0 : i32
    %c0_i32_1 = arith.constant 0 : i32
    return %c0_i32, %c0_i32_0 : i32, i32
  }
  func.func @transform_3(%arg0: i32, %arg1: memref<2xi32, #tpu.memory_space<smem>>) -> (i32, i32, i32) {
    %c0_i32 = arith.constant 0 : i32
    %c0_i32_0 = arith.constant 0 : i32
    %c0_i32_1 = arith.constant 0 : i32
    return %arg0, %c0_i32, %c0_i32_0 : i32, i32, i32
  }
  func.func @transform_4(%arg0: i32, %arg1: memref<2xi32, #tpu.memory_space<smem>>) -> (i32, i32, i32) {
    %c0_i32 = arith.constant 0 : i32
    %c0_i32_0 = arith.constant 0 : i32
    %c0_i32_1 = arith.constant 0 : i32
    return %arg0, %c0_i32, %c0_i32_0 : i32, i32, i32
  }
  func.func @transform_5(%arg0: i32, %arg1: memref<2xi32, #tpu.memory_space<smem>>) -> (i32, i32, i32) {
    %c0_i32 = arith.constant 0 : i32
    %c0_i32_0 = arith.constant 0 : i32
    %c0_i32_1 = arith.constant 0 : i32
    return %arg0, %c0_i32, %c0_i32_0 : i32, i32, i32
  }
}

</mosaic_0001>

<bundles_post_ra>
// kernel: tpu_custom_call.1
= control target key start
LH: loop header
LB: loop body
LE: loop exit
PB: predicated region body
PF: predicated region fallthrough
CT: control target
= control target key end

     0   :  { %s1922_s0 = inlined_call_operand.vmem [shape: s32[2], index: 0, kind: input, shape index: {}]   ;;  %s1923_s1 = inlined_call_operand.vmem [shape: f32[128,128], index: 1, kind: input, shape index: {}]   ;;  %s1924_s2 = inlined_call_operand.hbm [shape: bf16[128,128], index: 2, kind: input, shape index: {}]   ;;  %s1925_s3 = inlined_call_operand.vmem [shape: f32[128,1], index: 3, kind: input, shape index: {}]   ;;  %s1926_s4 = inlined_call_operand.hbm [shape: f32[2,128,128], index: 4, kind: input, shape index: {}]   ;;  %s1927_s5 = inlined_call_operand.vmem [shape: f32[2,1,128], index: 5, kind: input, shape index: {}]   ;;  %s1928_s6 = inlined_call_operand.hbm [shape: f32[2,128,128], index: 6, kind: output, shape index: {}]  }
   0x1   :  { %s11_s23 = sshll.u32 %s1922_s0, 4  ;;  %s12_s23 = int_to_ptr.vmem [resolvable:$true] %s11_s23 }
   0x2   :  { %s1276_s24 = scalar_lea.vmem %s12_s23, 16  ;;  %p1281_p1 = scmp.lt.s32.totalorder %s12_s23, %s12_s23 }
   0x3   :  { %p1277_p0 = scmp.ne.s32.totalorder %s12_s23, %s1276_s24  ;;  %p1282_p2 = scmp.lt.s32.totalorder %s1276_s24, %s1276_s24 }
   0x5   :  { %p1283_p3 = por %p1282_p2, %p1281_p1 }
   0x7   :  { %p1284_p4 = pnand %p1283_p3, %p1277_p0 }
   0x9   :  { %1287 = shalt.err (!%p1284_p4)  }
   0xa   :  { %s1422_s25 = smov [#allocation5]  }
   0xb   :  { %14 = dma.vmem_to_smem %s12_s23, 16, %s1422_s25, [#allocation4] }
   0xc   :  { %1390 = dma.done.wait [#allocation4], 16 }
   0xd   :  { %1391 = vsyncadd [#allocation4], 4294967280 }
   0xe   :  { %16 = sfence }
   0xf   :  { %17 = vsyncpa [#allocation7], 0 }
  0x10   :  { %18 = vsyncpa [#allocation10], 0 }
  0x11   :  { %20 = vsyncpa [#allocation10 + $0x1], 0 }
  0x12   :  { %21 = vsyncpa [#allocation8], 0 }
  0x13   :  { %23 = vsyncpa [#allocation8 + $0x1], 0  ;;  %s1471_s26 = smov 0   ;;  %s1473_s0 = smov 0  }
  0x14   :  { %s1475_s27 = smov 0   ;;  %s1477_s28 = smov 0  }
  0x15 LB: > { %s1492_s29 = sadd.s32 4294967295, %s1420_s28   ;;  %s1004_s30 = sadd.s32 4294967294, %s1420_s28   ;;  %s1420_s28 = sphi %s1477_s28, %s1949_s28   ;;  %s1416_s27 = sphi %s1475_s27, %s1948_s27   ;;  %s1412_s0 = sphi %s1473_s0, %s1947_s0   ;;  %s1408_s26 = sphi %s1471_s26, %s1946_s26  }
  0x16   : > { %p91_p5 = scmp.ne.s32.totalorder %s1412_s0, %s1408_s26  ;;  %p1929_p6 = scmp.eq.s32.totalorder %s1492_s29, 0 }
  0x17   : > { %p147_p8 = scmp.eq.s32.totalorder %s1004_s30, 1  ;;  %p1005_p10 = scmp.ge.s32.totalorder %s1420_s28, 1 }
  0x18   : > { %p1501_p9 = por %p1929_p6, %p91_p5  ;;  %p154_p12 = scmp.lt.s32.totalorder %s1420_s28, 3 }
  0x19   : > { %p1506_p11 = por %p147_p8, %p91_p5  ;;  %s1423_s10 = smov [#allocation6]  }
  0x1a   : > { %s1932_s7 = scalar_select %p1501_p9, 1, 0 }
  0x1b   : > { %s1933_s8 = scalar_select %p1506_p11, 1, 0 }
  0x1c   : > { %p1512_p0 = pnand %p1005_p10, %p154_p12  ;;  %s166_s11 = sshll.u32 %s1423_s10, 4  ;;  %s1516_s11 = int_to_ptr.vmem [resolvable:$true] %s166_s11 }
  0x1d   : > { %s1528_s13 = sadd.s32 1, %s1420_s28   ;;  %s78_s14 = sadd.s32 1, %s1416_s27 }
  0x1e   : > { %s1934_s9 = scalar_select %p1512_p0, 1, 0 }
  0x1f   : > { %p1209_p1 = pneg %p1512_p0  ;;  %s75_s15 = ssub.s32 %s1420_s28, %s1528_s13 }
  0x20   : > { %s1288_s18 = scalar_lea.hbm %s1924_s2, 1024 }
  0x21   : > { %p1523_p3 = pnand %p1209_p1, %p1929_p6  ;;  %p1289_p4 = scmp.ne.s32.totalorder %s1924_s2, %s1288_s18 }
  0x22   : > { %p1295_p12 = scmp.lt.u32.totalorder %s1288_s18, %s1924_s2 }
  0x23   : > { %p1290_p5 = pneg %p1523_p3 }
  0x25   : > { %p1291_p8 = pnand %p1290_p5, %p1289_p4 }
  0x27   : > { %p1292_p10 = pneg %p1291_p8 }
  0x29   : > { %p1297_p1 = pnand %p1295_p12, %p1292_p10 }
  0x2b   : > { %1300 = shalt.err (!%p1297_p1)
}
  0x2c   : > { %s1301_s23 = scalar_lea.vmem %s1516_s11, 1024  ;;  %p1309_p7 = scmp.lt.s32.totalorder %s1516_s11, %s1516_s11 }
  0x2d   : > { %p1302_p2 = scmp.ne.s32.totalorder %s1516_s11, %s1301_s23  ;;  %p1310_p11 = scmp.lt.s32.totalorder %s1301_s23, %s1301_s23 }
  0x2f   : > { %p1304_p13 = pnand %p1302_p2, %p1290_p5  ;;  %p1311_p9 = por %p1310_p11, %p1309_p7 }
  0x31   : > { %p1305_p6 = pneg %p1304_p13 }
  0x33   : > { %p1312_p0 = pnand %p1311_p9, %p1305_p6 }
  0x35   : > { %1315 = shalt.err (!%p1312_p0)
}
  0x36   : > { %s1424_s24 = smov 64   ;;  %s1425_s25 = smov 4  }
  0x37   : > { %1212 = dma.hbm_to_vmem [thread:$0]  (!%p1523_p3), %s1924_s2, 1024, %s1516_s11, [#allocation7], %s1424_s24, %s1424_s24, %s1425_s25  }
  0x38   : > { %p76_p7 = scmp.eq.s32.totalorder %s75_s15, 0  ;;  %p85_p6 = scmp.ne.s32.totalorder %s1416_s27, %s1412_s0 }
  0x39   : > { %p86_p9 = scmp.eq.s32.totalorder %s1420_s28, 0  ;;  %p1222_p11 = scmp.lt.s32.totalorder %s1420_s28, 2 }
  0x3a   : > { %s1559_s16 = scalar_select %p76_p7, %s1416_s27, %s78_s14  }
  0x3b   : > { %p87_p13 = por %p86_p9, %p85_p6  ;;  %p1936_p0 = scmp.eq.s32.totalorder %s1492_s29, 1 }
  0x3c   : > { %s183_s18 = sand.u32 1, %s1416_s27   ;;  %s1031_s19 = sshll.u32 %s1420_s28, 11 }
  0x3d   : > { %p1563_p2 = por %p1936_p0, %p85_p6  ;;  %s1008_s20 = sshll.u32 %s183_s18, 7 }
  0x3e   : > { %s1572_s22 = scalar_lea.hbm %s1926_s4, %s1031_s19  ;;  %s187_s11 = scalar_lea.vmem [#allocation9], %s1008_s20 }
  0x3f   : > { %s194_s14 = sshll.u32 %s187_s11, 4  ;;  %p1574_p3 = pnand %p1222_p11, %p87_p13  ;;  %s1578_s14 = int_to_ptr.vmem [resolvable:$true] %s194_s14 }
  0x40   : > { %s1580_s23 = scalar_lea.sflag [#allocation10], %s183_s18  ;;  %s1316_s24 = scalar_lea.hbm %s1572_s22, 2048 }
  0x41   : > { %p1317_p4 = scmp.ne.s32.totalorder %s1572_s22, %s1316_s24  ;;  %p1318_p5 = pneg %p1574_p3 }
  0x42   : > { %s1321_s10 = scalar_lea.hbm %s1926_s4, 4096  ;;  %p1322_p12 = scmp.lt.u32.totalorder %s1572_s22, %s1926_s4 }
  0x43   : > { %p1319_p8 = pnand %p1318_p5, %p1317_p4  ;;  %p1323_p1 = scmp.lt.u32.totalorder %s1321_s10, %s1316_s24 }
  0x44   : > { %p1325_p6 = scmp.lt.u32.totalorder %s1316_s24, %s1572_s22 }
  0x45   : > { %p1320_p10 = pneg %p1319_p8  ;;  %p1324_p7 = por %p1323_p1, %p1322_p12 }
  0x47   : > { %p1326_p9 = por %p1325_p6, %p1324_p7 }
  0x49   : > { %p1327_p11 = pnand %p1326_p9, %p1320_p10 }
  0x4b   : > { %1330 = shalt.err (!%p1327_p11)
}
  0x4c   : > { %s1331_s18 = scalar_lea.vmem %s1578_s14, 2048  ;;  %s1426_s12 = smov [#allocation9]  }
  0x4d   : > { %p1332_p13 = scmp.ne.s32.totalorder %s1578_s14, %s1331_s18  ;;  %s1336_s21 = sshll.u32 %s1426_s12, 4  ;;  %s1337_s21 = int_to_ptr.vmem [resolvable:$false] %s1336_s21 }
  0x4e   : > { %s1338_s11 = scalar_lea.vmem %s1337_s21, 4096  ;;  %p1339_p8 = scmp.lt.s32.totalorder %s1578_s14, %s1337_s21 }
  0x4f   : > { %p1334_p0 = pnand %p1332_p13, %p1318_p5  ;;  %p1340_p12 = scmp.lt.s32.totalorder %s1338_s11, %s1331_s18 }
  0x51   : > { %p1335_p4 = pneg %p1334_p0  ;;  %p1341_p1 = por %p1340_p12, %p1339_p8 }
  0x53   : > { %p1342_p7 = pnand %p1341_p1, %p1335_p4 }
  0x55   : > { %1345 = shalt.err (!%p1342_p7)
}
  0x56   : > { %s1427_s24 = smov 128   ;;  %s1428_s25 = smov 8  }
  0x57   : > { %1216 = dma.hbm_to_vmem [thread:$0]  (!%p1574_p3), %s1572_s22, 2048, %s1578_s14, %s1580_s23, %s1427_s24, %s1427_s24, %s1428_s25  }
  0x58   : > { %p1939_p5 = scmp.ne.s32.totalorder %s1934_s9, 0 }
  0x59   : > { %p1940_p10 = scmp.eq.s32.totalorder (!%p1939_p5), %s1492_s29, 0 }
  0x5a   : > { %212 = sbr.rel (%p1939_p5) target bundleno = 661 (0x295), region = 36 }
  0x61   : > { %1393 = dma.done.wait (%p1940_p10), [#allocation7], 1024   ;;  %p1941_p6 = pmov %p1940_p10 }
  0x62   : > { %s1615_s30 = sand.u32 1, %s1412_s0   ;;  %p1942_p3 = scmp.ne.s32.totalorder %s1932_s7, 0 }
  0x63   : > { %1395 = vsyncadd (%p1941_p6), [#allocation7], 4294966272  ;;  %s1013_s10 = sshll.u32 %s1615_s30, 7  ;;  %s219_s19 = scalar_lea.sflag [#allocation10], %s1615_s30 }
  0x64   : > { %s1619_s20 = scalar_lea.vmem [#allocation9], %s1013_s10 }
  0x65   : > { %1397 = dma.done.wait (%p1942_p3), %s219_s19, 2048  }
  0x66   : > { %1399 = vsyncadd (%p1942_p3), %s219_s19, 4294965248  ;;  %p250_p9 = scmp.lt.s32.totalorder %s1492_s29, 1  ;;  %s1633_s23 = scalar_lea.vmem [#allocation11], %s1013_s10 }
  0x67   : > { %p1943_p11 = scmp.ne.s32.totalorder %s1492_s29, 0 }
  0x68   : > { %s1627_s9 = scalar_select %p250_p9, %s1492_s29, 1 }
  0x69   : > { %257 = sbr.rel (%p1943_p11) target bundleno = 117 (0x75), region = 48  ;;  %v290_v0 = vld [vmem:[%s1923_s1] sm:$0xff] (!%p1943_p11)  ;;  %v292_v1 = vld [vmem:[%s1923_s1 + $0x8] sm:$0xff] (!%p1943_p11)  ;;  %v294_v2 = vld [vmem:[%s1923_s1 + $0x10] sm:$0xff] (!%p1943_p11) }
  0x6a   : > { %s252_s15 = scalar_lea.vmem %s1927_s5, %s1627_s9  ;;  %291 = vst [vmem:[#allocation2] sm:$0xff] (!%p1943_p11), %v290_v0  ;;  %293 = vst [vmem:[#allocation2 + $0x8] sm:$0xff] (!%p1943_p11), %v292_v1  ;;  %v296_v3 = vld [vmem:[%s1923_s1 + $0x18] sm:$0xff] (!%p1943_p11)  ;;  %v298_v4 = vld [vmem:[%s1923_s1 + $0x20] sm:$0xff] (!%p1943_p11) }
  0x6b   : > { %295 = vst [vmem:[#allocation2 + $0x10] sm:$0xff] (!%p1943_p11), %v294_v2  ;;  %v300_v5 = vld [vmem:[%s1923_s1 + $0x28] sm:$0xff] (!%p1943_p11)  ;;  %297 = vst [vmem:[#allocation2 + $0x18] sm:$0xff] (!%p1943_p11), %v296_v3  ;;  %v302_v6 = vld [vmem:[%s1923_s1 + $0x30] sm:$0xff] (!%p1943_p11) }
  0x6c   : > { %299 = vst [vmem:[#allocation2 + $0x20] sm:$0xff] (!%p1943_p11), %v298_v4  ;;  %301 = vst [vmem:[#allocation2 + $0x28] sm:$0xff] (!%p1943_p11), %v300_v5  ;;  %v304_v7 = vld [vmem:[%s1923_s1 + $0x38] sm:$0xff] (!%p1943_p11)  ;;  %v306_v8 = vld [vmem:[%s1923_s1 + $0x40] sm:$0xff] (!%p1943_p11) }
  0x6d   : > { %303 = vst [vmem:[#allocation2 + $0x30] sm:$0xff] (!%p1943_p11), %v302_v6  ;;  %305 = vst [vmem:[#allocation2 + $0x38] sm:$0xff] (!%p1943_p11), %v304_v7  ;;  %v308_v9 = vld [vmem:[%s1923_s1 + $0x48] sm:$0xff] (!%p1943_p11)  ;;  %v310_v10 = vld [vmem:[%s1923_s1 + $0x50] sm:$0xff] (!%p1943_p11) }
  0x6e   : > { %307 = vst [vmem:[#allocation2 + $0x40] sm:$0xff] (!%p1943_p11), %v306_v8  ;;  %v312_v11 = vld [vmem:[%s1923_s1 + $0x58] sm:$0xff] (!%p1943_p11)  ;;  %309 = vst [vmem:[#allocation2 + $0x48] sm:$0xff] (!%p1943_p11), %v308_v9  ;;  %v314_v12 = vld [vmem:[%s1923_s1 + $0x60] sm:$0xff] (!%p1943_p11) }
  0x6f   : > { %311 = vst [vmem:[#allocation2 + $0x50] sm:$0xff] (!%p1943_p11), %v310_v10  ;;  %313 = vst [vmem:[#allocation2 + $0x58] sm:$0xff] (!%p1943_p11), %v312_v11  ;;  %v316_v13 = vld [vmem:[%s1923_s1 + $0x68] sm:$0xff] (!%p1943_p11)  ;;  %v318_v14 = vld [vmem:[%s1923_s1 + $0x70] sm:$0xff] (!%p1943_p11) }
  0x70   : > { %315 = vst [vmem:[#allocation2 + $0x60] sm:$0xff] %v314_v12  ;;  %317 = vst [vmem:[#allocation2 + $0x68] sm:$0xff] %v316_v13  ;;  %v320_v15 = vld [vmem:[%s1923_s1 + $0x78] sm:$0xff] }
  0x71   : > { %319 = vst [vmem:[#allocation2 + $0x70] sm:$0xff] %v318_v14  ;;  %321 = vst [vmem:[#allocation2 + $0x78] sm:$0xff] %v320_v15 }
  0x72   : > { %329 = vsyncadd [#allocation3], 2048 }
  0x73   : > { %1400 = dma.done.wait [#allocation3], 2048 }
  0x74   : > { %1401 = vsyncadd [#allocation3], 4294965248 }
  0x75 PF: > { %v349_v16 = vld [vmem:[%s1619_s20] sm:$0xff]  ;;  %v350_v17 = vld [vmem:[%s1619_s20 + $0x8] sm:$0xff]  ;;  %v351_v18 = vld [vmem:[%s1619_s20 + $0x10] sm:$0xff]  ;;  %v1429_v21 = vmov 0   ;;  %s830_s19 = sld [smem:[#allocation5 + %s1492_s29]]  ;;  %s1032_s9 = sshll.u32 %s1492_s29, 11 }
  0x76   : > { %v1169_v19 = vpack.c.bf16 %v350_v17, %v349_v16  ;;  %v352_v20 = vld [vmem:[%s1619_s20 + $0x18] sm:$0xff]  ;;  %1266 = vset.pattern.permute.xlu0 %v1429_v21  ;;  %1267 = vset.pattern.permute.xlu1 %v1429_v21  ;;  %v353_v23 = vld [vmem:[%s1619_s20 + $0x20] sm:$0xff]  ;;  %v354_v24 = vld [vmem:[%s1619_s20 + $0x28] sm:$0xff]  ;;  %s1872_s29 = scalar_lea.hbm %s1928_s6, %s1032_s9  ;;  %s883_s7 = scalar_lea.sflag [#allocation8], %s1615_s30 }
  0x77   : > { %v1173_v22 = vpack.c.bf16 %v352_v20, %v351_v18  ;;  %v1177_v25 = vpack.c.bf16 %v354_v24, %v353_v23  ;;  %v366_v26 = vld [vmem:[#allocation2] sm:$0xff]  ;;  %v355_v27 = vld [vmem:[%s1619_s20 + $0x30] sm:$0xff]  ;;  %v356_v28 = vld [vmem:[%s1619_s20 + $0x38] sm:$0xff]  ;;  %s1430_s11 = smov [#allocation11]  }
  0x78   : > { %1170 = vmatprep.subr.bf16.mxu0 %v1169_v19  ;;  %1113 = vmatprep.mubr.f32.mxu0 %v366_v26  ;;  %v1181_v29 = vpack.c.bf16 %v356_v28, %v355_v27  ;;  %v357_v30 = vld [vmem:[%s1619_s20 + $0x40] sm:$0xff]  ;;  %v358_v31 = vld [vmem:[%s1619_s20 + $0x48] sm:$0xff]  ;;  %v335_v33 = vld [vmem:[%s1925_s3 + $0x10] sm:$0xff]  ;;  %s1350_s24 = sshll.u32 %s1430_s11, 4  ;;  %s1351_s24 = int_to_ptr.vmem [resolvable:$false] %s1350_s24 }
  0x79   : > { %1172 = vmatpush3.bf16.msra.mxu0 %v1169_v19  ;;  %v333_v32 = vld [vmem:[%s1925_s3] sm:$0xff]  ;;  %539 = vperm.xlu1 %1267, %v335_v33   ;;  %v334_v34 = vld [vmem:[%s1925_s3 + $0x8] sm:$0xff]  ;;  %v1185_v35 = vpack.c.bf16 %v358_v31, %v357_v30  ;;  %v336_v36 = vld [vmem:[%s1925_s3 + $0x18] sm:$0xff]  ;;  %s1352_s25 = scalar_lea.vmem %s1351_s24, 4096 }
  0x7a   : > { %1174 = vmatprep.subr.bf16.mxu0 %v1173_v22  ;;  %529 = vperm.xlu0 %1266, %v333_v32   ;;  %v359_v37 = vld [vmem:[%s1619_s20 + $0x50] sm:$0xff]  ;;  %v360_v38 = vld [vmem:[%s1619_s20 + $0x58] sm:$0xff]  ;;  %v337_v39 = vld [vmem:[%s1925_s3 + $0x20] sm:$0xff] }
  0x7b   : > { %v338_v40 = vld [vmem:[%s1925_s3 + $0x28] sm:$0xff]  ;;  %v361_v41 = vld [vmem:[%s1619_s20 + $0x60] sm:$0xff]  ;;  %v1189_v43 = vpack.c.bf16 %v360_v38, %v359_v37  ;;  %v339_v44 = vld [vmem:[%s1925_s3 + $0x30] sm:$0xff]  ;;  %p831_p13 = scmp.ne.s32.totalorder %s830_s19, 0 }
  0x7c   : > { %v362_v42 = vld [vmem:[%s1619_s20 + $0x68] sm:$0xff]  ;;  %v340_v46 = vld [vmem:[%s1925_s3 + $0x38] sm:$0xff]  ;;  %v363_v47 = vld [vmem:[%s1619_s20 + $0x70] sm:$0xff] }
  0x7d   : > { %1176 = vmatpush3.bf16.msra.mxu0 %v1173_v22  ;;  %544 = vperm.xlu1 %1267, %v336_v36   ;;  %v1193_v45 = vpack.c.bf16 %v362_v42, %v361_v41  ;;  %v364_v48 = vld [vmem:[%s1619_s20 + $0x78] sm:$0xff]  ;;  %v341_v49 = vld [vmem:[%s1925_s3 + $0x40] sm:$0xff]  ;;  %v342_v51 = vld [vmem:[%s1925_s3 + $0x48] sm:$0xff]  ;;  %s832_s22 = scalar_select %p831_p13, 0.0, -inf }
  0x7e   : > { %1178 = vmatprep.subr.bf16.mxu0 %v1177_v25  ;;  %534 = vperm.xlu0 %1266, %v334_v34   ;;  %v1197_v50 = vpack.c.bf16 %v364_v48, %v363_v47  ;;  %v343_v52 = vld [vmem:[%s1925_s3 + $0x50] sm:$0xff]  ;;  %v344_v53 = vld [vmem:[%s1925_s3 + $0x58] sm:$0xff]  ;;  %v367_v54 = vld [vmem:[#allocation2 + $0x8] sm:$0xff] }
  0x7f   : > { %v345_v55 = vld [vmem:[%s1925_s3 + $0x60] sm:$0xff]  ;;  %v368_v56 = vld [vmem:[#allocation2 + $0x10] sm:$0xff]  ;;  %v346_v57 = vld [vmem:[%s1925_s3 + $0x68] sm:$0xff] }
  0x80   : > { %v369_v58 = vld [vmem:[#allocation2 + $0x18] sm:$0xff]  ;;  %v347_v59 = vld [vmem:[%s1925_s3 + $0x70] sm:$0xff]  ;;  %v370_v60 = vld [vmem:[#allocation2 + $0x20] sm:$0xff] }
  0x81   : > { %1180 = vmatpush3.bf16.msra.mxu0 %v1177_v25  ;;  %554 = vperm.xlu1 %1267, %v338_v40   ;;  %v348_v61 = vld [vmem:[%s1925_s3 + $0x78] sm:$0xff]  ;;  %v371_v62 = vld [vmem:[#allocation2 + $0x28] sm:$0xff]  ;;  %v372_v63 = vld [vmem:[#allocation2 + $0x30] sm:$0xff] }
  0x82   : > { %1182 = vmatprep.subr.bf16.mxu0 %v1181_v29  ;;  %549 = vperm.xlu0 %1266, %v337_v39   ;;  %v373_v0 = vld [vmem:[#allocation2 + $0x38] sm:$0xff]  ;;  %v374_v1 = vld [vmem:[#allocation2 + $0x40] sm:$0xff]  ;;  %v375_v2 = vld [vmem:[#allocation2 + $0x48] sm:$0xff] }
  0x83   : > { %v376_v3 = vld [vmem:[#allocation2 + $0x50] sm:$0xff]  ;;  %v377_v4 = vld [vmem:[#allocation2 + $0x58] sm:$0xff]  ;;  %v378_v5 = vld [vmem:[#allocation2 + $0x60] sm:$0xff] }
  0x84   : > { %v379_v6 = vld [vmem:[#allocation2 + $0x68] sm:$0xff]  ;;  %v380_v7 = vld [vmem:[#allocation2 + $0x70] sm:$0xff]  ;;  %v381_v8 = vld [vmem:[#allocation2 + $0x78] sm:$0xff] }
  0x85   : > { %1184 = vmatpush3.bf16.msra.mxu0 %v1181_v29  ;;  %564 = vperm.xlu1 %1267, %v340_v46   ;;  %v1268_v9 = vld [vmem:[#allocation6] sm:$0xff]  }
  0x86   : > { %1186 = vmatprep.subr.bf16.mxu0 %v1185_v35  ;;  %559 = vperm.xlu0 %1266, %v339_v44  }
  0x87   : > { %1153 = vmatprep.mubr.bf16.mxu1 %v1268_v9  ;;  %v1803_v9 = vld [vmem:[%s252_s15] ss:$0 sm:$0xff]  ;;  %s896_s15 = sshll.u32 %s1633_s23, 4  ;;  %s1874_s15 = int_to_ptr.vmem [resolvable:$true] %s896_s15 }
  0x88   : > { %s1346_s21 = scalar_lea.vmem %s1874_s15, 2048  ;;  %p1353_p12 = scmp.lt.s32.totalorder %s1874_s15, %s1351_s24 }
  0x89   : > { %1188 = vmatpush3.bf16.msra.mxu0 %v1185_v35  ;;  %574 = vperm.xlu1 %1267, %v342_v51   ;;  %p1347_p0 = scmp.ne.s32.totalorder %s1874_s15, %s1346_s21  ;;  %p1354_p1 = scmp.lt.s32.totalorder %s1352_s25, %s1346_s21 }
  0x8a   : > { %1190 = vmatprep.subr.bf16.mxu0 %v1189_v43  ;;  %569 = vperm.xlu0 %1266, %v341_v49  }
  0x8b   : > { %p1348_p4 = pnand %p1347_p0, %p1563_p2  ;;  %p1355_p7 = por %p1354_p1, %p1353_p12 }
  0x8d   : > { %1192 = vmatpush3.bf16.msra.mxu0 %v1189_v43  ;;  %584 = vperm.xlu1 %1267, %v344_v53   ;;  %p1349_p8 = pneg %p1348_p4 }
  0x8e   : > { %1194 = vmatprep.subr.bf16.mxu0 %v1193_v45  ;;  %579 = vperm.xlu0 %1266, %v343_v52  }
  0x8f   : > { %p1356_p5 = pnand %p1355_p7, %p1349_p8 }
  0x91   : > { %1196 = vmatpush3.bf16.msra.mxu0 %v1193_v45  ;;  %594 = vperm.xlu1 %1267, %v346_v57  }
  0x92   : > { %1198 = vmatprep.subr.bf16.mxu0 %v1197_v50  ;;  %589 = vperm.xlu0 %1266, %v345_v55  }
  0x95   : > { %1200 = vmatpush3.bf16.msra.mxu0 %v1197_v50  ;;  %604 = vperm.xlu1 %1267, %v348_v61  }
  0x96   : > { %599 = vperm.xlu0 %1266, %v347_v59  }
  0x98   : > { %1114 = vmatmul.mubr.f32.vlgmr.msra.gmra.mrb[0].mxu0 %v367_v54 }
  0x99   : > { %1116 = vmatprep.mubr.f32.mxu0 %v368_v56 }
  0x9c   : > { %1117 = vmatmul.mubr.f32.gmra.mrb[2].mxu0 %v369_v58 }
  0x9d   : > { %1119 = vmatprep.mubr.f32.mxu0 %v370_v60 }
  0xa0   : > { %1120 = vmatmul.mubr.f32.gmra.mrb[4].mxu0 %v371_v62 }
  0xa1   : > { %1122 = vmatprep.mubr.f32.mxu0 %v372_v63 }
  0xa4   : > { %1123 = vmatmul.mubr.f32.gmra.mrb[6].mxu0 %v373_v0 }
  0xa5   : > { %1125 = vmatprep.mubr.f32.mxu0 %v374_v1 }
  0xa8   : > { %1126 = vmatmul.mubr.f32.gmra.mrb[8].mxu0 %v375_v2  ;;  %v1269_v2 = vld [vmem:[#allocation6 + $0x8] sm:$0xff]  }
  0xa9   : > { %1128 = vmatprep.mubr.f32.mxu0 %v376_v3  ;;  %v1270_v3 = vld [vmem:[#allocation6 + $0x10] sm:$0xff]  }
  0xac   : > { %1129 = vmatmul.mubr.f32.gmra.mrb[10].mxu0 %v377_v4  ;;  %v1271_v4 = vld [vmem:[#allocation6 + $0x18] sm:$0xff]  }
  0xad   : > { %1131 = vmatprep.mubr.f32.mxu0 %v378_v5  ;;  %v1272_v5 = vld [vmem:[#allocation6 + $0x20] sm:$0xff]  }
  0xb0   : > { %1132 = vmatmul.mubr.f32.gmra.mrb[12].mxu0 %v379_v6  ;;  %v1273_v6 = vld [vmem:[#allocation6 + $0x28] sm:$0xff]  }
  0xb1   : > { %1134 = vmatprep.mubr.f32.mxu0 %v380_v7  ;;  %v1274_v7 = vld [vmem:[#allocation6 + $0x30] sm:$0xff]  }
  0xb4   : > { %1135 = vmatmul.mubr.f32.gmra.mrb[14].mxu0 %v381_v8  ;;  %v1275_v8 = vld [vmem:[#allocation6 + $0x38] sm:$0xff]  }
  0xf8   : > { %v1749_v10 = vpop.permute.xlu1 %539 }
  0xf9   : > { %v1751_v11 = vpop.permute.xlu0 %529 }
  0xfc   : > { %v1753_v12 = vpop.permute.xlu1 %544 }
  0xfd   : > { %v1755_v13 = vpop.permute.xlu0 %534 }
 0x100   : > { %v1757_v14 = vpop.permute.xlu1 %554 }
 0x101   : > { %v1759_v15 = vpop.permute.xlu0 %549 }
 0x104   : > { %v1763_v20 = vpop.permute.xlu1 %564 }
 0x105   : > { %v1765_v23 = vpop.permute.xlu0 %559 }
 0x108   : > { %v1770_v31 = vpop.permute.xlu1 %574 }
 0x109   : > { %v1773_v33 = vpop.permute.xlu0 %569 }
 0x10c   : > { %v1777_v39 = vpop.permute.xlu1 %584 }
 0x10d   : > { %v1779_v42 = vpop.permute.xlu0 %579 }
 0x110   : > { %v1784_v50 = vpop.permute.xlu1 %594 }
 0x111   : > { %v1787_v52 = vpop.permute.xlu0 %589 }
 0x114   : > { %v1791_v58 = vpop.permute.xlu1 %604 }
 0x115   : > { %v1793_v61 = vpop.permute.xlu0 %599 }
 0x16b   : > { %v1115_v16 = vpop.f32.mrb[0].mxu0 }
 0x16c   : > { %v608_v17 = vmul.f32 %v1115_v16, %v1755_v13  ;;  %v448_v18 = vpop.f32.mrb[1].mxu0 }
 0x16d   : > { %v607_v19 = vmul.f32 %v1751_v11, %v448_v18 }
 0x16f   : > { %v1118_v21 = vpop.f32.mrb[2].mxu0  ;;  %v623_v22 = vpack.c.bf16 %v608_v17, %v607_v19  ;;  %v1806_v19 = vstv %s832_s22 }
 0x170   : > { %v610_v24 = vmul.f32 %v1118_v21, %v1753_v12  ;;  %v458_v25 = vpop.f32.mrb[3].mxu0 }
 0x171   : > { %v609_v26 = vmul.f32 %v1749_v10, %v458_v25  ;;  %1137 = vmatprep.subr.bf16.mxu1 %v623_v22 }
 0x172   : > { %1138 = vmatpush3.bf16.msra.mxu1 %v623_v22 }
 0x173   : > { %v624_v27 = vpack.c.bf16 %v610_v24, %v609_v26  ;;  %v1121_v28 = vpop.f32.mrb[4].mxu0 }
 0x174   : > { %v612_v29 = vmul.f32 %v1121_v28, %v1757_v14  ;;  %v468_v30 = vpop.f32.mrb[5].mxu0 }
 0x175   : > { %v611_v32 = vmul.f32 %v1759_v15, %v468_v30  ;;  %1139 = vmatprep.subr.bf16.mxu1 %v624_v27 }
 0x176   : > { %1140 = vmatpush3.bf16.msra.mxu1 %v624_v27 }
 0x177   : > { %v625_v34 = vpack.c.bf16 %v612_v29, %v611_v32  ;;  %v1124_v35 = vpop.f32.mrb[6].mxu0 }
 0x178   : > { %v614_v36 = vmul.f32 %v1124_v35, %v1763_v20  ;;  %v478_v37 = vpop.f32.mrb[7].mxu0 }
 0x179   : > { %v613_v38 = vmul.f32 %v1765_v23, %v478_v37  ;;  %1141 = vmatprep.subr.bf16.mxu1 %v625_v34 }
 0x17a   : > { %1142 = vmatpush3.bf16.msra.mxu1 %v625_v34 }
 0x17b   : > { %v626_v40 = vpack.c.bf16 %v614_v36, %v613_v38  ;;  %v1127_v41 = vpop.f32.mrb[8].mxu0 }
 0x17c   : > { %v616_v43 = vmul.f32 %v1127_v41, %v1770_v31  ;;  %v488_v44 = vpop.f32.mrb[9].mxu0 }
 0x17d   : > { %v615_v45 = vmul.f32 %v1773_v33, %v488_v44  ;;  %1143 = vmatprep.subr.bf16.mxu1 %v626_v40 }
 0x17e   : > { %1144 = vmatpush3.bf16.msra.mxu1 %v626_v40 }
 0x17f   : > { %v627_v46 = vpack.c.bf16 %v616_v43, %v615_v45  ;;  %v1130_v47 = vpop.f32.mrb[10].mxu0 }
 0x180   : > { %v618_v48 = vmul.f32 %v1130_v47, %v1777_v39  ;;  %v498_v49 = vpop.f32.mrb[11].mxu0 }
 0x181   : > { %v617_v51 = vmul.f32 %v1779_v42, %v498_v49  ;;  %1145 = vmatprep.subr.bf16.mxu1 %v627_v46 }
 0x182   : > { %1146 = vmatpush3.bf16.msra.mxu1 %v627_v46 }
 0x183   : > { %v628_v53 = vpack.c.bf16 %v618_v48, %v617_v51  ;;  %v1133_v54 = vpop.f32.mrb[12].mxu0 }
 0x184   : > { %v620_v55 = vmul.f32 %v1133_v54, %v1784_v50  ;;  %v508_v56 = vpop.f32.mrb[13].mxu0 }
 0x185   : > { %v619_v57 = vmul.f32 %v1787_v52, %v508_v56  ;;  %1147 = vmatprep.subr.bf16.mxu1 %v628_v53 }
 0x186   : > { %1148 = vmatpush3.bf16.msra.mxu1 %v628_v53 }
 0x187   : > { %v629_v59 = vpack.c.bf16 %v620_v55, %v619_v57  ;;  %v1136_v60 = vpop.f32.mrb[14].mxu0 }
 0x188   : > { %v622_v62 = vmul.f32 %v1136_v60, %v1791_v58  ;;  %v518_v63 = vpop.f32.mrb[15].mxu0 }
 0x189   : > { %v621_v0 = vmul.f32 %v1793_v61, %v518_v63  ;;  %1149 = vmatprep.subr.bf16.mxu1 %v629_v59 }
 0x18a   : > { %1150 = vmatpush3.bf16.msra.mxu1 %v629_v59 }
 0x18b   : > { %v630_v1 = vpack.c.bf16 %v622_v62, %v621_v0 }
 0x18d   : > { %1151 = vmatprep.subr.bf16.mxu1 %v630_v1 }
 0x18e   : > { %1152 = vmatpush3.bf16.msra.mxu1 %v630_v1 }
 0x191   : > { %1154 = vmatmul.mubr.bf16.vlgmr.msra.gmra.mrb[0].mxu1 %v1269_v2 }
 0x192   : > { %1157 = vmatprep.mubr.bf16.mxu1 %v1270_v3 }
 0x199   : > { %1158 = vmatmul.mubr.bf16.gmra.mrb[4].mxu1 %v1271_v4 }
 0x19a   : > { %1161 = vmatprep.mubr.bf16.mxu1 %v1272_v5 }
 0x1a1   : > { %1162 = vmatmul.mubr.bf16.gmra.mrb[8].mxu1 %v1273_v6 }
 0x1a2   : > { %1165 = vmatprep.mubr.bf16.mxu1 %v1274_v7 }
 0x1a9   : > { %1166 = vmatmul.mubr.bf16.gmra.mrb[12].mxu1 %v1275_v8 }
 0x264   : > { %v1155_v16 = vpop.f32.mrb[0].mxu1 }
 0x265   : > { %v794_v17 = vmul.f32 %v1155_v16, %v1749_v10  ;;  %v729_v18 = vpop.f32.mrb[1].mxu1 }
 0x266   : > { %v792_v21 = vmul.f32 %v729_v18, %v1751_v11  ;;  %v1156_v22 = vpop.f32.mrb[2].mxu1 }
 0x267   : > { %v816_v24 = vadd.f32 %v1803_v9, %v794_v17  ;;  %v795_v25 = vmul.f32 %v1156_v22, %v1753_v12  ;;  %v732_v26 = vpop.f32.mrb[3].mxu1 }
 0x268   : > { %v814_v27 = vadd.f32 %v1803_v9, %v792_v21  ;;  %v793_v28 = vmul.f32 %v732_v26, %v1755_v13 }
 0x269   : > { %v836_v10 = vmax.f32 %v816_v24, %v1806_v19  ;;  %v817_v29 = vadd.f32 %v1803_v9, %v795_v25 }
 0x26a   : > { %v834_v30 = vmax.f32 %v814_v27, %v1806_v19  ;;  %v815_v11 = vadd.f32 %v1803_v9, %v793_v28 }
 0x26b   : > { %852 = vst [vmem:[%s1633_s23 + $0x10] sm:$0xff] %v836_v10  ;;  %868 = vst [vmem:[#allocation2 + $0x10] sm:$0xff] %v836_v10  ;;  %v837_v32 = vmax.f32 %v817_v29, %v1806_v19 }
 0x26c   : > { %850 = vst [vmem:[%s1633_s23] sm:$0xff] %v834_v30  ;;  %866 = vst [vmem:[#allocation2] sm:$0xff] %v834_v30  ;;  %v835_v12 = vmax.f32 %v815_v11, %v1806_v19  ;;  %v1159_v34 = vpop.f32.mrb[4].mxu1 }
 0x26d   : > { %853 = vst [vmem:[%s1633_s23 + $0x18] sm:$0xff] %v837_v32  ;;  %869 = vst [vmem:[#allocation2 + $0x18] sm:$0xff] %v837_v32  ;;  %v798_v13 = vmul.f32 %v1159_v34, %v1765_v23  ;;  %v745_v35 = vpop.f32.mrb[5].mxu1 }
 0x26e   : > { %851 = vst [vmem:[%s1633_s23 + $0x8] sm:$0xff] %v835_v12  ;;  %867 = vst [vmem:[#allocation2 + $0x8] sm:$0xff] %v835_v12  ;;  %v796_v36 = vmul.f32 %v745_v35, %v1759_v15  ;;  %v1160_v37 = vpop.f32.mrb[6].mxu1 }
 0x26f   : > { %v820_v38 = vadd.f32 %v1803_v9, %v798_v13  ;;  %v799_v40 = vmul.f32 %v1160_v37, %v1763_v20  ;;  %v748_v41 = vpop.f32.mrb[7].mxu1 }
 0x270   : > { %v818_v43 = vadd.f32 %v1803_v9, %v796_v36  ;;  %v797_v44 = vmul.f32 %v748_v41, %v1757_v14 }
 0x271   : > { %v840_v23 = vmax.f32 %v820_v38, %v1806_v19  ;;  %v821_v45 = vadd.f32 %v1803_v9, %v799_v40 }
 0x272   : > { %v838_v46 = vmax.f32 %v818_v43, %v1806_v19  ;;  %v819_v15 = vadd.f32 %v1803_v9, %v797_v44 }
 0x273   : > { %856 = vst [vmem:[%s1633_s23 + $0x30] sm:$0xff] %v840_v23  ;;  %872 = vst [vmem:[#allocation2 + $0x30] sm:$0xff] %v840_v23  ;;  %v841_v47 = vmax.f32 %v821_v45, %v1806_v19 }
 0x274   : > { %854 = vst [vmem:[%s1633_s23 + $0x20] sm:$0xff] %v838_v46  ;;  %870 = vst [vmem:[#allocation2 + $0x20] sm:$0xff] %v838_v46  ;;  %v839_v20 = vmax.f32 %v819_v15, %v1806_v19  ;;  %v1163_v48 = vpop.f32.mrb[8].mxu1 }
 0x275   : > { %857 = vst [vmem:[%s1633_s23 + $0x38] sm:$0xff] %v841_v47  ;;  %873 = vst [vmem:[#allocation2 + $0x38] sm:$0xff] %v841_v47  ;;  %v802_v14 = vmul.f32 %v1163_v48, %v1779_v42  ;;  %v761_v49 = vpop.f32.mrb[9].mxu1 }
 0x276   : > { %855 = vst [vmem:[%s1633_s23 + $0x28] sm:$0xff] %v839_v20  ;;  %871 = vst [vmem:[#allocation2 + $0x28] sm:$0xff] %v839_v20  ;;  %v800_v51 = vmul.f32 %v761_v49, %v1773_v33  ;;  %v1164_v53 = vpop.f32.mrb[10].mxu1 }
 0x277   : > { %v824_v54 = vadd.f32 %v1803_v9, %v802_v14  ;;  %v803_v55 = vmul.f32 %v1164_v53, %v1777_v39  ;;  %v764_v56 = vpop.f32.mrb[11].mxu1 }
 0x278   : > { %v822_v57 = vadd.f32 %v1803_v9, %v800_v51  ;;  %v801_v59 = vmul.f32 %v764_v56, %v1770_v31 }
 0x279   : > { %v844_v42 = vmax.f32 %v824_v54, %v1806_v19  ;;  %v825_v60 = vadd.f32 %v1803_v9, %v803_v55 }
 0x27a   : > { %v842_v62 = vmax.f32 %v822_v57, %v1806_v19  ;;  %v823_v33 = vadd.f32 %v1803_v9, %v801_v59 }
 0x27b   : > { %860 = vst [vmem:[%s1633_s23 + $0x50] sm:$0xff] %v844_v42  ;;  %876 = vst [vmem:[#allocation2 + $0x50] sm:$0xff] %v844_v42  ;;  %v845_v63 = vmax.f32 %v825_v60, %v1806_v19 }
 0x27c   : > { %858 = vst [vmem:[%s1633_s23 + $0x40] sm:$0xff] %v842_v62  ;;  %874 = vst [vmem:[#allocation2 + $0x40] sm:$0xff] %v842_v62  ;;  %v843_v39 = vmax.f32 %v823_v33, %v1806_v19  ;;  %v1167_v31 = vpop.f32.mrb[12].mxu1 }
 0x27d   : > { %861 = vst [vmem:[%s1633_s23 + $0x58] sm:$0xff] %v845_v63  ;;  %877 = vst [vmem:[#allocation2 + $0x58] sm:$0xff] %v845_v63  ;;  %v806_v0 = vmul.f32 %v1167_v31, %v1793_v61  ;;  %v777_v1 = vpop.f32.mrb[13].mxu1 }
 0x27e   : > { %859 = vst [vmem:[%s1633_s23 + $0x48] sm:$0xff] %v843_v39  ;;  %875 = vst [vmem:[#allocation2 + $0x48] sm:$0xff] %v843_v39  ;;  %v804_v2 = vmul.f32 %v777_v1, %v1787_v52  ;;  %v1168_v3 = vpop.f32.mrb[14].mxu1 }
 0x27f   : > { %v828_v4 = vadd.f32 %v1803_v9, %v806_v0  ;;  %v807_v5 = vmul.f32 %v1168_v3, %v1791_v58  ;;  %v780_v6 = vpop.f32.mrb[15].mxu1 }
 0x280   : > { %v826_v7 = vadd.f32 %v1803_v9, %v804_v2  ;;  %v805_v8 = vmul.f32 %v780_v6, %v1784_v50 }
 0x281   : > { %v848_v61 = vmax.f32 %v828_v4, %v1806_v19  ;;  %v829_v52 = vadd.f32 %v1803_v9, %v807_v5 }
 0x282   : > { %v846_v16 = vmax.f32 %v826_v7, %v1806_v19  ;;  %v827_v17 = vadd.f32 %v1803_v9, %v805_v8 }
 0x283   : > { %864 = vst [vmem:[%s1633_s23 + $0x70] sm:$0xff] %v848_v61  ;;  %880 = vst [vmem:[#allocation2 + $0x70] sm:$0xff] %v848_v61  ;;  %v849_v58 = vmax.f32 %v829_v52, %v1806_v19 }
 0x284   : > { %862 = vst [vmem:[%s1633_s23 + $0x60] sm:$0xff] %v846_v16  ;;  %878 = vst [vmem:[#allocation2 + $0x60] sm:$0xff] %v846_v16  ;;  %v847_v50 = vmax.f32 %v827_v17, %v1806_v19 }
 0x285   : > { %865 = vst [vmem:[%s1633_s23 + $0x78] sm:$0xff] %v849_v58  ;;  %881 = vst [vmem:[#allocation2 + $0x78] sm:$0xff] %v849_v58 }
 0x286   : > { %863 = vst [vmem:[%s1633_s23 + $0x68] sm:$0xff] %v847_v50  ;;  %879 = vst [vmem:[#allocation2 + $0x68] sm:$0xff] %v847_v50 }
 0x287   : > { %1359 = shalt.err (!%p1356_p5)
}
 0x288   : > { %s1360_s23 = scalar_lea.hbm %s1872_s29, 2048  ;;  %s1364_s22 = scalar_lea.hbm %s1928_s6, 4096 }
 0x289   : > { %p1361_p10 = scmp.ne.s32.totalorder %s1872_s29, %s1360_s23  ;;  %p1365_p9 = scmp.lt.u32.totalorder %s1872_s29, %s1928_s6 }
 0x28a   : > { %p1366_p11 = scmp.lt.u32.totalorder %s1364_s22, %s1360_s23  ;;  %p1368_p0 = scmp.lt.u32.totalorder %s1360_s23, %s1872_s29 }
 0x28b   : > { %p1362_p6 = pnand %p1361_p10, %p1563_p2 }
 0x28c   : > { %p1367_p13 = por %p1366_p11, %p1365_p9 }
 0x28d   : > { %p1363_p3 = pneg %p1362_p6 }
 0x28e   : > { %p1369_p4 = por %p1368_p0, %p1367_p13 }
 0x290   : > { %p1370_p8 = pnand %p1369_p4, %p1363_p3 }
 0x292   : > { %1373 = shalt.err (!%p1370_p8)
}
 0x293   : > { %s1431_s9 = smov 128   ;;  %s1432_s18 = smov 8  }
 0x294   : > { %1207 = dma.vmem_to_hbm [thread:$0]  (%p1563_p2), %s1874_s15, 2048, %s1872_s29, %s883_s7, %s1431_s9, %s1431_s9, %s1432_s18  }
 0x295 PF: > { %s911_s12 = sand.u32 1, %s1408_s26   ;;  %p1944_p12 = scmp.ne.s32.totalorder %s1933_s8, 0 }
 0x296   : > { %p1945_p1 = scmp.ge.s32.totalorder %s1420_s28, 2  ;;  %s912_s21 = scalar_lea.sflag [#allocation8], %s911_s12 }
 0x298   : > { %p1218_p7 = pnand %p1945_p1, %p1944_p12 }
 0x29a   : > { %1403 = dma.done.wait (!%p1218_p7), %s912_s21, 2048  }
 0x29b   : > { %1405 = vsyncadd (!%p1218_p7), %s912_s21, 4294965248  ;;  %p26_p5 = scmp.ge.s32.totalorder %s1528_s13, 4   ;;  %s1946_s26 = smov %s1412_s0 }
 0x29c   : > { %s1947_s0 = smov %s1416_s27  ;;  %s1948_s27 = smov %s1559_s16 }
 0x29d   : > { %s1949_s28 = smov %s1528_s13  ;;  %28 = sbr.rel (!%p26_p5) target bundleno = 21 (0x15), region = 135 }
 0x2a4   :  { %917 = vsyncpa [#allocation7], 1 }
 0x2a5   :  { %919 = vsyncpa [#allocation7 + $0x1], 1 }
 0x2a6   :  { %920 = vsyncpa [#allocation10], 1 }
 0x2a7   :  { %922 = vsyncpa [#allocation10 + $0x1], 1 }
 0x2a8   :  { %923 = vsyncpa [#allocation8], 1 }
 0x2a9   :  { %925 = vsyncpa [#allocation8 + $0x1], 1 }
 0x2aa   :  { %926 = vsyncmov [#allocation3] }
 0x2ad   :  { %s927_s28 = vpop.sfrf %926 }
 0x2ae   :  { %p1030_p2 = scmp.ne.s32.totalorder %s927_s28, 0 }
 0x2b0   :  { %931 = shalt.err (%p1030_p2)  }

</bundles_post_ra>
